<compile_context>
chip_gen: v7x
topology: tpu7x:2x2x1
jax: 0.10.0
libtpu: 0.0.40
codegen_flags: <defaults>
</compile_context>

<pallas_src>
import functools
import math

import jax
import jax.numpy as jnp
from jax.experimental import pallas as pl
from jax.experimental.pallas import tpu as pltpu


def _mha_kernel(x_ref, wqkv_ref, bqkv_ref, wo_ref, bo_ref, o_ref, *, bb, H, d, S):
    """One batch-block per grid step.

    x_ref:    (bb*S, D)   activations (f32)
    wqkv_ref: (D, 3*D)    [Wq.T*scale | Wk.T | Wv.T]  (bf16)
    bqkv_ref: (1, 3*D)    [bq*scale | bk | bv]        (f32)
    wo_ref:   (D, D)      Wo.T                        (bf16)
    bo_ref:   (1, D)      bo                          (f32)
    o_ref:    (bb*S, D)
    """
    M, D = x_ref.shape
    G = bb * H

    # ---- fused QKV projection: one (M, D) x (D, 3D) MXU matmul --------------
    x = x_ref[...].astype(jnp.bfloat16)
    qkv = jnp.dot(x, wqkv_ref[...],
                  preferred_element_type=jnp.float32) + bqkv_ref[...]   # (M, 3D) f32

    # Split [q | k | v] and split heads: (M, D) -> (bb, H, S, d), g = b*H + h.
    def split_heads(t):  # t: (M, D)
        t = t.reshape(bb, S, H, d).transpose(0, 2, 1, 3)                # (bb, H, S, d)
        return t.reshape(G, S, d).astype(jnp.bfloat16)

    q = split_heads(qkv[:, 0 * D:1 * D])   # scale already folded into Wq / bq
    k = split_heads(qkv[:, 1 * D:2 * D])
    v = split_heads(qkv[:, 2 * D:3 * D])

    # ---- per-head scaled dot-product attention -------------------------------
    # scores[g,i,j] = sum_d q[g,i,d] * k[g,j,d]  (contraction on k's last dim, no .T)
    scores = jnp.einsum('gqd,gkd->gqk', q, k,
                        preferred_element_type=jnp.float32)             # (G, S, S) f32

    # Numerically stable softmax over keys; normalization deferred past PV matmul.
    m = jnp.max(scores, axis=-1, keepdims=True)
    e = jnp.exp(scores - m)                                             # f32
    denom = jnp.sum(e, axis=-1, keepdims=True)
    ctx = jnp.einsum('gqk,gkd->gqd', e.astype(jnp.bfloat16), v,
                     preferred_element_type=jnp.float32)                # (G, S, d)
    ctx = ctx * pl.reciprocal(denom, approx=True)        # EUP slot, otherwise idle

    # ---- merge heads + single (M, D) x (D, D) output projection --------------
    ctx = ctx.reshape(bb, H, S, d).transpose(0, 2, 1, 3).reshape(M, D)
    out = jnp.dot(ctx.astype(jnp.bfloat16), wo_ref[...],
                  preferred_element_type=jnp.float32) + bo_ref[...]     # (M, D) f32

    o_ref[...] = out.astype(o_ref.dtype)


def self_attention_multihead(x, params, *, batch_block=1):
    """x: (B, S, D) float32.  params: PyTorch-convention weights ([out, in]) / biases."""
    B, S, D = x.shape
    H = params["head_num"]
    assert D % H == 0
    d = D // H
    bb = batch_block
    assert B % bb == 0, "batch_block must divide batch"

    f32 = jnp.float32
    bf16 = jnp.bfloat16
    scale = 1.0 / math.sqrt(d)

    # nn.Linear stores W as [out, in]; x @ W.T uses W.T of shape (in, out).
    # Fold 1/sqrt(d) into the Q projection (weights + bias) in the wrapper (free).
    wqkv = jnp.concatenate(
        [params["wq"].T.astype(f32) * scale,
         params["wk"].T.astype(f32),
         params["wv"].T.astype(f32)], axis=1).astype(bf16)              # (D, 3D)
    bqkv = jnp.concatenate(
        [params["bq"].astype(f32) * scale,
         params["bk"].astype(f32),
         params["bv"].astype(f32)]).reshape(1, 3 * D)                   # (1, 3D)
    wo = params["wo"].T.astype(bf16)                                    # (D, D)
    bo = params["bo"].reshape(1, D).astype(f32)                         # (1, D)

    x2 = x.reshape(B * S, D)          # lane-dense 2-D slab at the kernel boundary
    rows = bb * S

    kernel = functools.partial(_mha_kernel, bb=bb, H=H, d=d, S=S)

    out2 = pl.pallas_call(
        kernel,
        out_shape=jax.ShapeDtypeStruct((B * S, D), x.dtype),
        grid_spec=pltpu.PrefetchScalarGridSpec(
            num_scalar_prefetch=0,
            grid=(B // bb,),
            in_specs=[
                pl.BlockSpec((rows, D), lambda i: (i, 0)),          # x block
                pl.BlockSpec((D, 3 * D), lambda i: (0, 0)),         # Wqkv (grid-invariant)
                pl.BlockSpec((1, 3 * D), lambda i: (0, 0)),         # bqkv
                pl.BlockSpec((D, D), lambda i: (0, 0)),             # Wo
                pl.BlockSpec((1, D), lambda i: (0, 0)),             # bo
            ],
            out_specs=pl.BlockSpec((rows, D), lambda i: (i, 0)),
        ),
        compiler_params=pltpu.CompilerParams(
            dimension_semantics=("parallel",),
            # 48 MiB: safe on v7x (64 MiB physical); re-derive upward (~96-112 MiB)
            # on v5e/v6e when enlarging bb/S tiles.
            vmem_limit_bytes=48 * 1024 * 1024,
        ),
    )(x2, wqkv, bqkv, wo, bo)

    return out2.reshape(B, S, D)


def _reference(x, params):
    """Pure-JAX reference mirroring the PyTorch forward exactly (f32)."""
    B, S, D = x.shape
    H = params["head_num"]
    d = D // H

    def linear(inp, w, b):  # w: [out, in]
        return inp @ w.T + b

    q = linear(x, params["wq"], params["bq"]).reshape(B, S, H, d).transpose(0, 2, 1, 3)
    k = linear(x, params["wk"], params["bk"]).reshape(B, S, H, d).transpose(0, 2, 1, 3)
    v = linear(x, params["wv"], params["bv"]).reshape(B, S, H, d).transpose(0, 2, 1, 3)

    scores = jnp.einsum("bhqd,bhkd->bhqk", q, k) / math.sqrt(d)
    attn = jax.nn.softmax(scores, axis=-1)
    ctx = jnp.einsum("bhqk,bhkd->bhqd", attn, v)
    ctx = ctx.transpose(0, 2, 1, 3).reshape(B, S, D)
    return linear(ctx, params["wo"], params["bo"])


if __name__ == "__main__":
    B, S, D, H = 2, 8, 32, 4  # batch, seq, input_dim, head_num

    key = jax.random.PRNGKey(0)
    keys = jax.random.split(key, 9)
    init = lambda k, shape: (jax.random.normal(k, shape, jnp.float32) * 0.1)

    params = {
        "head_num": H,
        "wq": init(keys[0], (D, D)), "bq": init(keys[1], (D,)),
        "wk": init(keys[2], (D, D)), "bk": init(keys[3], (D,)),
        "wv": init(keys[4], (D, D)), "bv": init(keys[5], (D,)),
        "wo": init(keys[6], (D, D)), "bo": init(keys[7], (D,)),
    }
    x = jax.random.normal(keys[8], (B, S, D), jnp.float32)

    out = self_attention_multihead(x, params, batch_block=1)
    out = jax.block_until_ready(out)

    ref = _reference(x, params)
    assert out.shape == (B, S, D)
    # bf16 MXU inputs + approx reciprocal -> relaxed tolerance vs f32 reference.
    assert jnp.allclose(out, ref, atol=1e-2, rtol=1e-2), "mismatch vs reference"

    print("KERNEL_OK")
</pallas_src>

<mosaic_0001>
module attributes {stable_mosaic.version = 11 : i64} {
  func.func @_mha_kernel(%arg0: i32, %arg1: memref<8x32xf32, #tpu.memory_space<vmem>>, %arg2: memref<32x96xbf16, #tpu.memory_space<vmem>>, %arg3: memref<1x96xf32, #tpu.memory_space<vmem>>, %arg4: memref<32x32xbf16, #tpu.memory_space<vmem>>, %arg5: memref<1x32xf32, #tpu.memory_space<vmem>>, %arg6: memref<8x32xf32, #tpu.memory_space<vmem>>) attributes {dimension_semantics = [#tpu.dimension_semantics<parallel>], iteration_bounds = array<i64: 2>, scalar_prefetch = 0 : i64, scratch_operands = 0 : i64, tpu.core_type = #tpu.core_type<tc>, window_params = [{transform_indices = @transform_0, window_bounds = array<i64: 8, 32>}, {pipeline_mode = #tpu.pipeline_mode<synchronous>, transform_indices = @transform_1, window_bounds = array<i64: 32, 96>}, {pipeline_mode = #tpu.pipeline_mode<synchronous>, transform_indices = @transform_2, window_bounds = array<i64: 1, 96>}, {pipeline_mode = #tpu.pipeline_mode<synchronous>, transform_indices = @transform_3, window_bounds = array<i64: 32, 32>}, {pipeline_mode = #tpu.pipeline_mode<synchronous>, transform_indices = @transform_4, window_bounds = array<i64: 1, 32>}, {transform_indices = @transform_5, window_bounds = array<i64: 8, 32>}]} {
    %c0 = arith.constant 0 : index
    %c0_0 = arith.constant 0 : index
    %0 = vector.load %arg1[%c0, %c0_0] : memref<8x32xf32, #tpu.memory_space<vmem>>, vector<8x32xf32>
    %1 = arith.truncf %0 : vector<8x32xf32> to vector<8x32xbf16>
    %c0_1 = arith.constant 0 : index
    %c0_2 = arith.constant 0 : index
    %2 = vector.load %arg2[%c0_1, %c0_2] : memref<32x96xbf16, #tpu.memory_space<vmem>>, vector<32x96xbf16>
    %cst = arith.constant dense<0.000000e+00> : vector<8x96xf32>
    %3 = tpu.matmul %1, %2, %cst {dimension_numbers = #tpu.dot_dimension_numbers<[1], [0], [0], [1], [0, 0, 1, 1], [], []>} : vector<8x32xbf16>, vector<32x96xbf16>, vector<8x96xf32> -> vector<8x96xf32>
    %c0_3 = arith.constant 0 : index
    %c0_4 = arith.constant 0 : index
    %4 = vector.load %arg3[%c0_3, %c0_4] : memref<1x96xf32, #tpu.memory_space<vmem>>, vector<1x96xf32>
    %5 = vector.broadcast %4 : vector<1x96xf32> to vector<8x96xf32>
    %6 = arith.addf %3, %5 : vector<8x96xf32>
    %7 = vector.extract_strided_slice %6 {offsets = [0, 0], sizes = [8, 32], strides = [1, 1]} : vector<8x96xf32> to vector<8x32xf32>
    %8 = vector.shape_cast %7 : vector<8x32xf32> to vector<1x8x4x8xf32>
    %9 = tpu.transpose %8, [0, 2, 1, 3] : vector<1x8x4x8xf32> -> vector<1x4x8x8xf32>
    %10 = vector.shape_cast %9 : vector<1x4x8x8xf32> to vector<4x8x8xf32>
    %11 = arith.truncf %10 : vector<4x8x8xf32> to vector<4x8x8xbf16>
    %12 = vector.extract_strided_slice %6 {offsets = [0, 32], sizes = [8, 32], strides = [1, 1]} : vector<8x96xf32> to vector<8x32xf32>
    %13 = vector.shape_cast %12 : vector<8x32xf32> to vector<1x8x4x8xf32>
    %14 = tpu.transpose %13, [0, 2, 1, 3] : vector<1x8x4x8xf32> -> vector<1x4x8x8xf32>
    %15 = vector.shape_cast %14 : vector<1x4x8x8xf32> to vector<4x8x8xf32>
    %16 = arith.truncf %15 : vector<4x8x8xf32> to vector<4x8x8xbf16>
    %17 = vector.extract_strided_slice %6 {offsets = [0, 64], sizes = [8, 32], strides = [1, 1]} : vector<8x96xf32> to vector<8x32xf32>
    %18 = vector.shape_cast %17 : vector<8x32xf32> to vector<1x8x4x8xf32>
    %19 = tpu.transpose %18, [0, 2, 1, 3] : vector<1x8x4x8xf32> -> vector<1x4x8x8xf32>
    %20 = vector.shape_cast %19 : vector<1x4x8x8xf32> to vector<4x8x8xf32>
    %21 = arith.truncf %20 : vector<4x8x8xf32> to vector<4x8x8xbf16>
    "tpu.trace_start"() <{level = 10 : i32, message = "gqd,gkd->gqk"}> : () -> ()
    %cst_5 = arith.constant dense<0.000000e+00> : vector<4x8x8xf32>
    %22 = tpu.matmul %11, %16, %cst_5 {dimension_numbers = #tpu.dot_dimension_numbers<[2], [2], [1], [1], [0, 0, 0, 1, 1, 1], [0], [0]>} : vector<4x8x8xbf16>, vector<4x8x8xbf16>, vector<4x8x8xf32> -> vector<4x8x8xf32>
    "tpu.trace_stop"() : () -> ()
    %cst_6 = arith.constant dense<0xFF800000> : vector<4x8xf32>
    %23 = vector.multi_reduction <maximumf>, %22, %cst_6 [2] : vector<4x8x8xf32> to vector<4x8xf32>
    %24 = vector.shape_cast %23 : vector<4x8xf32> to vector<4x8x1xf32>
    %25 = vector.broadcast %24 : vector<4x8x1xf32> to vector<4x8x8xf32>
    %26 = arith.subf %22, %25 : vector<4x8x8xf32>
    %27 = math.exp %26 : vector<4x8x8xf32>
    %cst_7 = arith.constant dense<0.000000e+00> : vector<4x8xf32>
    %28 = vector.multi_reduction <add>, %27, %cst_7 [2] : vector<4x8x8xf32> to vector<4x8xf32>
    %29 = vector.shape_cast %28 : vector<4x8xf32> to vector<4x8x1xf32>
    %30 = arith.truncf %27 : vector<4x8x8xf32> to vector<4x8x8xbf16>
    "tpu.trace_start"() <{level = 10 : i32, message = "gqk,gkd->gqd"}> : () -> ()
    %cst_8 = arith.constant dense<0.000000e+00> : vector<4x8x8xf32>
    %31 = tpu.matmul %30, %21, %cst_8 {dimension_numbers = #tpu.dot_dimension_numbers<[2], [1], [1], [2], [0, 0, 0, 1, 1, 2], [0], [0]>} : vector<4x8x8xbf16>, vector<4x8x8xbf16>, vector<4x8x8xf32> -> vector<4x8x8xf32>
    "tpu.trace_stop"() : () -> ()
    %32 = tpu.reciprocal %29 {approx = true} : vector<4x8x1xf32> -> vector<4x8x1xf32>
    %33 = vector.broadcast %32 : vector<4x8x1xf32> to vector<4x8x8xf32>
    %34 = arith.mulf %31, %33 : vector<4x8x8xf32>
    %35 = vector.shape_cast %34 : vector<4x8x8xf32> to vector<1x4x8x8xf32>
    %36 = tpu.transpose %35, [0, 2, 1, 3] : vector<1x4x8x8xf32> -> vector<1x8x4x8xf32>
    %37 = vector.shape_cast %36 : vector<1x8x4x8xf32> to vector<8x32xf32>
    %38 = arith.truncf %37 : vector<8x32xf32> to vector<8x32xbf16>
    %c0_9 = arith.constant 0 : index
    %c0_10 = arith.constant 0 : index
    %39 = vector.load %arg4[%c0_9, %c0_10] : memref<32x32xbf16, #tpu.memory_space<vmem>>, vector<32x32xbf16>
    %cst_11 = arith.constant dense<0.000000e+00> : vector<8x32xf32>
    %40 = tpu.matmul %38, %39, %cst_11 {dimension_numbers = #tpu.dot_dimension_numbers<[1], [0], [0], [1], [0, 0, 1, 1], [], []>} : vector<8x32xbf16>, vector<32x32xbf16>, vector<8x32xf32> -> vector<8x32xf32>
    %c0_12 = arith.constant 0 : index
    %c0_13 = arith.constant 0 : index
    %41 = vector.load %arg5[%c0_12, %c0_13] : memref<1x32xf32, #tpu.memory_space<vmem>>, vector<1x32xf32>
    %42 = vector.broadcast %41 : vector<1x32xf32> to vector<8x32xf32>
    %43 = arith.addf %40, %42 : vector<8x32xf32>
    %c0_14 = arith.constant 0 : index
    %c0_15 = arith.constant 0 : index
    %44 = vector.load %arg6[%c0_14, %c0_15] : memref<8x32xf32, #tpu.memory_space<vmem>>, vector<8x32xf32>
    tpu.vector_store %arg6[%c0_14, %c0_15], %43 {strides = array<i32>} : memref<8x32xf32, #tpu.memory_space<vmem>>, vector<8x32xf32>,
    return
  }
  func.func @transform_0(%arg0: i32) -> (i32, i32) {
    %c0_i32 = arith.constant 0 : i32
    %c0_i32_0 = arith.constant 0 : i32
    return %arg0, %c0_i32 : i32, i32
  }
  func.func @transform_1(%arg0: i32) -> (i32, i32) {
    %c0_i32 = arith.constant 0 : i32
    %c0_i32_0 = arith.constant 0 : i32
    %c0_i32_1 = arith.constant 0 : i32
    return %c0_i32, %c0_i32_0 : i32, i32
  }
  func.func @transform_2(%arg0: i32) -> (i32, i32) {
    %c0_i32 = arith.constant 0 : i32
    %c0_i32_0 = arith.constant 0 : i32
    %c0_i32_1 = arith.constant 0 : i32
    return %c0_i32, %c0_i32_0 : i32, i32
  }
  func.func @transform_3(%arg0: i32) -> (i32, i32) {
    %c0_i32 = arith.constant 0 : i32
    %c0_i32_0 = arith.constant 0 : i32
    %c0_i32_1 = arith.constant 0 : i32
    return %c0_i32, %c0_i32_0 : i32, i32
  }
  func.func @transform_4(%arg0: i32) -> (i32, i32) {
    %c0_i32 = arith.constant 0 : i32
    %c0_i32_0 = arith.constant 0 : i32
    %c0_i32_1 = arith.constant 0 : i32
    return %c0_i32, %c0_i32_0 : i32, i32
  }
  func.func @transform_5(%arg0: i32) -> (i32, i32) {
    %c0_i32 = arith.constant 0 : i32
    %c0_i32_0 = arith.constant 0 : i32
    return %arg0, %c0_i32 : i32, i32
  }
}

</mosaic_0001>

<bundles_post_ra>
// kernel: tpu_custom_call.1
= control target key start
LH: loop header
LB: loop body
LE: loop exit
PB: predicated region body
PF: predicated region fallthrough
CT: control target
= control target key end

     0   :  { %10 = vsyncpa [#allocation3], 0  ;;  %s2359_s0 = inlined_call_operand.hbm [shape: f32[16,32], index: 0, kind: input, shape index: {}]   ;;  %s2360_s1 = inlined_call_operand.hbm [shape: bf16[32,96], index: 1, kind: input, shape index: {}]   ;;  %s2361_s2 = inlined_call_operand.vmem [shape: f32[1,96], index: 2, kind: input, shape index: {}]   ;;  %s2362_s3 = inlined_call_operand.hbm [shape: bf16[32,32], index: 3, kind: input, shape index: {}]   ;;  %s2363_s4 = inlined_call_operand.vmem [shape: f32[1,32], index: 4, kind: input, shape index: {}]   ;;  %s2364_s5 = inlined_call_operand.hbm [shape: f32[16,32], index: 5, kind: output, shape index: {}]  }
   0x1   :  { %12 = vsyncpa [#allocation3 + $0x1], 0 }
   0x2   :  { %13 = vsyncpa [#allocation6], 0 }
   0x3   :  { %14 = vsyncpa [#allocation4], 0 }
   0x4   :  { %16 = vsyncpa [#allocation4 + $0x1], 0  ;;  %s1968_s18 = smov 0   ;;  %s1970_s19 = smov 0  }
   0x5   :  { %s1972_s20 = smov 0   ;;  %s1974_s21 = smov 0  }
   0x6 LB: > { %s1989_s22 = sadd.s32 4294967295, %s1918_s21   ;;  %s1535_s23 = sadd.s32 4294967294, %s1918_s21   ;;  %s1918_s21 = sphi %s1974_s21, %s2384_s21   ;;  %s1914_s20 = sphi %s1972_s20, %s2383_s20   ;;  %s1910_s19 = sphi %s1970_s19, %s2382_s19   ;;  %s1906_s18 = sphi %s1968_s18, %s2381_s18  }
   0x7   : > { %p42_p0 = scmp.ne.s32.totalorder %s1910_s19, %s1906_s18  ;;  %p2365_p1 = scmp.eq.s32.totalorder %s1989_s22, 0 }
   0x8   : > { %p156_p3 = scmp.eq.s32.totalorder %s1535_s23, 1  ;;  %p1536_p5 = scmp.ge.s32.totalorder %s1918_s21, 1 }
   0x9   : > { %p1998_p4 = por %p2365_p1, %p42_p0  ;;  %p163_p7 = scmp.lt.s32.totalorder %s1918_s21, 3 }
   0xa   : > { %p2003_p6 = por %p156_p3, %p42_p0  ;;  %s1920_s27 = smov [#allocation5]  }
   0xb   : > { %s2368_s24 = scalar_select %p1998_p4, 1, 0 }
   0xc   : > { %s2369_s25 = scalar_select %p2003_p6, 1, 0 }
   0xd   : > { %p2008_p8 = pnand %p1536_p5, %p163_p7  ;;  %s175_s28 = sshll.u32 %s1920_s27, 4  ;;  %s2012_s28 = int_to_ptr.vmem [resolvable:$true] %s175_s28 }
   0xe   : > { %s1921_s30 = smov [#allocation7]   ;;  %s1762_s9 = scalar_lea.hbm %s2360_s1, 256 }
   0xf   : > { %p1673_p9 = pneg %p2008_p8  ;;  %s191_s6 = sshll.u32 %s1921_s30, 4  ;;  %s2023_s6 = int_to_ptr.vmem [resolvable:$true] %s191_s6 }
  0x10   : > { %p1763_p12 = scmp.ne.s32.totalorder %s2360_s1, %s1762_s9  ;;  %p1769_p5 = scmp.lt.u32.totalorder %s1762_s9, %s2360_s1 }
  0x11   : > { %p2019_p11 = pnand %p1673_p9, %p2365_p1 }
  0x13   : > { %p1764_p13 = pneg %p2019_p11 }
  0x15   : > { %p1765_p0 = pnand %p1764_p13, %p1763_p12 }
  0x17   : > { %p1766_p3 = pneg %p1765_p0 }
  0x19   : > { %p1771_p7 = pnand %p1769_p5, %p1766_p3 }
  0x1b   : > { %1774 = shalt.err (!%p1771_p7)
}
  0x1c   : > { %s1775_s14 = scalar_lea.vmem %s2012_s28, 256  ;;  %p1783_p2 = scmp.lt.s32.totalorder %s2012_s28, %s2012_s28 }
  0x1d   : > { %p1776_p9 = scmp.ne.s32.totalorder %s2012_s28, %s1775_s14  ;;  %p1784_p12 = scmp.lt.s32.totalorder %s1775_s14, %s1775_s14 }
  0x1f   : > { %p1778_p10 = pnand %p1776_p9, %p1764_p13  ;;  %p1785_p0 = por %p1784_p12, %p1783_p2 }
  0x21   : > { %p1779_p1 = pneg %p1778_p10 }
  0x23   : > { %p1786_p6 = pnand %p1785_p0, %p1779_p1 }
  0x25   : > { %1789 = shalt.err (!%p1786_p6)
}
  0x26   : > { %s1922_s15 = smov 64   ;;  %s1923_s16 = smov 4  }
  0x27   : > { %1676 = dma.hbm_to_vmem [thread:$0]  (!%p2019_p11), %s2360_s1, 256, %s2012_s28, [#allocation6], %s1922_s15, %s1922_s15, %s1923_s16  }
  0x28   : > { %s1790_s7 = scalar_lea.hbm %s2362_s3, 256 }
  0x29   : > { %p1791_p2 = scmp.ne.s32.totalorder %s2362_s3, %s1790_s7  ;;  %p1797_p10 = scmp.lt.u32.totalorder %s1790_s7, %s2362_s3 }
  0x2b   : > { %p1793_p1 = pnand %p1791_p2, %p1764_p13 }
  0x2d   : > { %p1794_p6 = pneg %p1793_p1 }
  0x2f   : > { %p1799_p3 = pnand %p1797_p10, %p1794_p6 }
  0x31   : > { %1802 = shalt.err (!%p1799_p3)
}
  0x32   : > { %s1803_s28 = scalar_lea.vmem %s2023_s6, 256  ;;  %p1811_p12 = scmp.lt.s32.totalorder %s2023_s6, %s2023_s6 }
  0x33   : > { %p1804_p5 = scmp.ne.s32.totalorder %s2023_s6, %s1803_s28  ;;  %p1812_p0 = scmp.lt.s32.totalorder %s1803_s28, %s1803_s28 }
  0x35   : > { %p1806_p7 = pnand %p1804_p5, %p1764_p13  ;;  %p1813_p2 = por %p1812_p0, %p1811_p12 }
  0x37   : > { %p1807_p9 = pneg %p1806_p7 }
  0x39   : > { %p1814_p1 = pnand %p1813_p2, %p1807_p9 }
  0x3b   : > { %1817 = shalt.err (!%p1814_p1)
}
  0x3c   : > { %1679 = dma.hbm_to_vmem [thread:$0]  (!%p2019_p11), %s2362_s3, 256, %s2023_s6, [#allocation6], %s1922_s15, %s1922_s15, %s1923_s16  }
  0x3d   : > { %s2078_s14 = sadd.s32 1, %s1918_s21   ;;  %s29_s29 = sadd.s32 1, %s1914_s20 }
  0x3e   : > { %s26_s17 = ssub.s32 %s1918_s21, %s2078_s14  ;;  %p36_p13 = scmp.ne.s32.totalorder %s1914_s20, %s1910_s19 }
  0x3f   : > { %p27_p6 = scmp.eq.s32.totalorder %s26_s17, 0  ;;  %p37_p10 = scmp.eq.s32.totalorder %s1918_s21, 0 }
  0x40   : > { %p2372_p3 = scmp.eq.s32.totalorder %s1989_s22, 1  ;;  %p1690_p7 = scmp.lt.s32.totalorder %s1918_s21, 2 }
  0x41   : > { %s2094_s27 = scalar_select %p27_p6, %s1914_s20, %s29_s29  }
  0x42   : > { %p2088_p5 = por %p2372_p3, %p36_p13  ;;  %p38_p9 = por %p37_p10, %p36_p13 }
  0x43   : > { %s208_s30 = sand.u32 1, %s1914_s20   ;;  %s1541_s6 = sshll.u32 %s1918_s21, 7 }
  0x44   : > { %s2373_s23 = scalar_select %p2088_p5, 1, 0 }
  0x45   : > { %s1540_s7 = sshll.u32 %s208_s30, 3  ;;  %s2101_s8 = scalar_lea.hbm %s2359_s0, %s1541_s6 }
  0x46   : > { %s212_s9 = scalar_lea.vmem [#allocation2], %s1540_s7  ;;  %p2105_p11 = pnand %p1690_p7, %p38_p9 }
  0x47   : > { %s219_s10 = sshll.u32 %s212_s9, 4  ;;  %s209_s28 = scalar_lea.sflag [#allocation3], %s208_s30  ;;  %s2103_s10 = int_to_ptr.vmem [resolvable:$true] %s219_s10 }
  0x48   : > { %s1818_s12 = scalar_lea.hbm %s2101_s8, 128  ;;  %p1820_p0 = pneg %p2105_p11 }
  0x49   : > { %p1819_p12 = scmp.ne.s32.totalorder %s2101_s8, %s1818_s12  ;;  %s1823_s17 = scalar_lea.hbm %s2359_s0, 256 }
  0x4a   : > { %p1824_p13 = scmp.lt.u32.totalorder %s2101_s8, %s2359_s0  ;;  %p1825_p6 = scmp.lt.u32.totalorder %s1823_s17, %s1818_s12 }
  0x4b   : > { %p1821_p2 = pnand %p1820_p0, %p1819_p12  ;;  %p1827_p3 = scmp.lt.u32.totalorder %s1818_s12, %s2101_s8 }
  0x4c   : > { %p1826_p10 = por %p1825_p6, %p1824_p13 }
  0x4d   : > { %p1822_p1 = pneg %p1821_p2 }
  0x4e   : > { %p1828_p7 = por %p1827_p3, %p1826_p10 }
  0x50   : > { %p1829_p9 = pnand %p1828_p7, %p1822_p1 }
  0x52   : > { %1832 = shalt.err (!%p1829_p9)
}
  0x53   : > { %s1833_s30 = scalar_lea.vmem %s2103_s10, 128  ;;  %s1924_s15 = smov [#allocation2]  }
  0x54   : > { %p1834_p12 = scmp.ne.s32.totalorder %s2103_s10, %s1833_s30  ;;  %s1838_s16 = sshll.u32 %s1924_s15, 4  ;;  %s1839_s16 = int_to_ptr.vmem [resolvable:$false] %s1838_s16 }
  0x55   : > { %s1840_s9 = scalar_lea.vmem %s1839_s16, 256  ;;  %p1841_p4 = scmp.lt.s32.totalorder %s2103_s10, %s1839_s16 }
  0x56   : > { %p1836_p2 = pnand %p1834_p12, %p1820_p0  ;;  %p1842_p13 = scmp.lt.s32.totalorder %s1840_s9, %s1833_s30 }
  0x58   : > { %p1837_p5 = pneg %p1836_p2  ;;  %p1843_p6 = por %p1842_p13, %p1841_p4 }
  0x5a   : > { %p1844_p10 = pnand %p1843_p6, %p1837_p5 }
  0x5c   : > { %1847 = shalt.err (!%p1844_p10)
}
  0x5d   : > { %1683 = dma.hbm_to_vmem [thread:$0]  (!%p2105_p11), %s2101_s8, 128, %s2103_s10, %s209_s28  }
  0x5e   : > { %228 = sbr.rel (%p2008_p8) target bundleno = 1599 (0x63f), region = 40  ;;  %s2137_s12 = sand.u32 (!%p2008_p8), 1, %s1910_s19  }
  0x5f   : > { %s1543_s13 = sshll.u32 (!%p2008_p8), %s2137_s12, 3  ;;  %s231_s29 = scalar_lea.sflag (!%p2008_p8), [#allocation3], %s2137_s12 }
  0x60   : > { %s234_s17 = scalar_lea.vmem (!%p2008_p8), [#allocation2], %s1543_s13  ;;  %p2375_p4 = scmp.ne.s32.totalorder (!%p2008_p8), %s2368_s24, 0 }
  0x65   : > { %1893 = dma.done.wait (%p2375_p4), %s231_s29, 128  }
  0x66   : > { %1895 = vsyncadd (%p2375_p4), %s231_s29, 4294967168  ;;  %p2376_p5 = scmp.eq.s32.totalorder %s1989_s22, 0 }
  0x68   : > { %1897 = dma.done.wait (%p2376_p5), [#allocation6], 512   ;;  %p2377_p8 = pmov %p2376_p5 }
  0x69   : > { %v1925_v0 = vmov 0.0   ;;  %vm1926_vm0 = vmmov 0   ;;  %v1742_v1 = vld [vmem:[#allocation5] sm:$0xff]   ;;  %v1743_v2 = vld [vmem:[#allocation5 + $0x8] sm:$0xff]   ;;  %v270_v3 = vld [vmem:[%s234_s17] sm:$0xff]  ;;  %vm295_vm1 = vcmask 261120   ;;  %v354_v16 = vlaneseq }
  0x6a   : > { %1899 = vsyncadd (%p2377_p8), [#allocation6], 4294966784  ;;  %1597 = vmatprep.subr.bf16.mxu0 %v1925_v0  ;;  %1601 = vmatprep.mubr.msk.bf16.mxu0 %vm1926_vm0, %v1925_v0  ;;  %v271_v4 = vpack.c.bf16 %v270_v3, %v270_v3  ;;  %v1547_v5 = vld [vmem:[%s2361_s2] ss:$0 sm:$0xff]  ;;  %s1927_s8 = smov 104   ;;  %s1928_s10 = smov 120  }
  0x6b   : > { %1605 = vmatprep.subr.bf16.mxu1 %v1925_v0  ;;  %1607 = vmatprep.mubr.msk.bf16.mxu1 %vm1926_vm0, %v1925_v0  ;;  %s1929_s11 = smov 96   ;;  %s1930_s28 = smov 112   ;;  %v1932_v14 = vmov 1983009808   ;;  %v355_v18 = vshrl.u32 %v354_v16, 7  ;;  %vm793_vm2 = vcmask 64512  }
  0x6c   : > { %1598 = vmatpush3.bf16.msra.mxu0 %v1742_v1  ;;  %s1931_s7 = smov 64   ;;  %v352_v15 = vunpack.c.l.s4 %v1932_v14  ;;  %v1933_v19 = vmov 1934713408   ;;  %vm1021_vm3 = vcmask 1043456   ;;  %s1934_s6 = smov 16   ;;  %vm1360_vm4 = vcmask 130048  }
  0x6d   : > { %1599 = vmatprep.subr.bf16.mxu0 %v1925_v0  ;;  %v384_v20 = vunpack.c.l.s4 %v1933_v19  ;;  %s1935_s30 = smov 8   ;;  %s1936_s15 = smov 24   ;;  %vm1362_vm5 = vcmask 195584  }
  0x6e   : > { %v353_v17 = vunpack.c.0.s8 %v352_v15  ;;  %s1572_s29 = sshll.u32 %s1989_s22, 7  ;;  %s268_s17 = scalar_lea.vmem [#allocation8], %s1543_s13 }
  0x6f   : > { %v385_v26 = vunpack.c.0.s8 %v384_v20  ;;  %s1446_s24 = sshll.u32 %s268_s17, 4  ;;  %s1433_s22 = scalar_lea.sflag [#allocation4], %s2137_s12  ;;  %s2316_s24 = int_to_ptr.vmem [resolvable:$true] %s1446_s24 }
  0x70   : > { %1600 = vmatpush3.bf16.msra.mxu0 %v1743_v2  ;;  %v2175_v23 = vsub.s32 %v353_v17, %v355_v18  ;;  %s1848_s13 = scalar_lea.vmem %s2316_s24, 128  ;;  %p2378_p0 = scmp.ne.s32.totalorder %s2373_s23, 0 }
  0x71   : > { %1611 = vmatprep.subr.bf16.mxu0 %v1925_v0  ;;  %v2183_v33 = vsub.s32 %v385_v26, %v355_v18  ;;  %p1849_p11 = scmp.ne.s32.totalorder %s2316_s24, %s1848_s13 }
  0x73   : > { %1602 = vmatmul.mubr.msk.bf16.vlgmr.msra.gmra.mrb[0].mxu0 %vm295_vm1, %v271_v4  ;;  %p1850_p1 = pnand %p1849_p11, %p2378_p0 }
  0x74   : > { %1613 = vmatprep.mubr.msk.bf16.mxu0 %vm1926_vm0, %v1925_v0 }
  0x75   : > { %p1851_p3 = pneg %p1850_p1 }
 0x146   : > { %v333_v6 = vpop.f32.mrb[0].mxu0 }
 0x147   : > { %v334_v7 = vadd.f32 %v1547_v5, %v333_v6  ;;  %v1603_v8 = vpop.f32.mrb[1].mxu0 }
 0x148   : > { %v336_v9 = vpop.f32.mrb[2].mxu0 }
 0x149   : > { %346 = vrot.lane.b32.xlu1 %v334_v7, %s1927_s8  ;;  %340 = vrot.lane.b32.xlu0 %v334_v7, %s1928_s10  ;;  %v1604_v10 = vpop.f32.mrb[3].mxu0  ;;  %s2314_s10 = scalar_lea.hbm %s2364_s5, %s1572_s29 }
 0x14d   : > { %489 = vrot.lane.b32.xlu1 %v334_v7, %s1929_s11  ;;  %343 = vrot.lane.b32.xlu0 %v334_v7, %s1930_s28 }
 0x1bb   : > { %v341_v11 = vpop.permute.xlu0 %340  ;;  %v2165_v12 = vpop.permute.xlu1 %346 }
 0x1bc   : > { %491 = vrot.lane.b32.xlu0 %v341_v11, %s1929_s11  ;;  %v365_v24 = vcombine.low %v341_v11, %v2165_v12  ;;  %v366_v25 = vcombine.high %v341_v11, %v2165_v12 }
 0x1be   : > { %v373_v29 = vrot.slane %v365_v24, %v2175_v23  ;;  %v380_v30 = vrot.slane %v366_v25, %v2175_v23 }
 0x1bf   : > { %v2167_v13 = vpop.permute.xlu0 %343  ;;  %v490_v31 = vpop.permute.xlu1 %489 }
 0x1c0   : > { %495 = vrot.lane.b32.xlu0 %v2165_v12, %s1929_s11  ;;  %493 = vrot.lane.b32.xlu1 %v2167_v13, %s1929_s11  ;;  %v349_v21 = vcombine.low %v334_v7, %v2167_v13  ;;  %v350_v22 = vcombine.high %v334_v7, %v2167_v13  ;;  %s1937_s11 = smov [#allocation8]  }
 0x1c1   : > { %s1852_s28 = sshll.u32 %s1937_s11, 4  ;;  %s1853_s28 = int_to_ptr.vmem [resolvable:$false] %s1852_s28 }
 0x1c2   : > { %v357_v27 = vrot.slane %v349_v21, %v2175_v23  ;;  %v364_v28 = vrot.slane %v350_v22, %v2175_v23  ;;  %p1855_p7 = scmp.lt.s32.totalorder %s2316_s24, %s1853_s28 }
 0x1c4   : > { %641 = vrot.lane.b32.xlu0 %v334_v7, %s1931_s7  ;;  %643 = vrot.lane.b32.xlu1 %v341_v11, %s1931_s7  ;;  %v381_v34 = vcombine.low %v357_v27, %v373_v29  ;;  %v382_v35 = vcombine.high %v357_v27, %v373_v29  ;;  %v397_v36 = vcombine.low %v364_v28, %v380_v30 }
 0x1c5   : > { %v398_v37 = vcombine.high %v364_v28, %v380_v30 }
 0x1c6   : > { %v389_v44 = vrot.slane %v381_v34, %v2183_v33  ;;  %v396_v45 = vrot.slane %v382_v35, %v2183_v33  ;;  %v405_v46 = vrot.slane %v397_v36, %v2183_v33 }
 0x1c7   : > { %v412_v47 = vrot.slane %v398_v37, %v2183_v33 }
 0x1c8   : > { %v417_v56 = vcombine.low %v389_v44, %v396_v45  ;;  %v1551_v57 = vcombine.high %v389_v44, %v396_v45 }
 0x1c9   : > { %v433_v58 = vcombine.low %v405_v46, %v412_v47  ;;  %v1552_v59 = vcombine.high %v405_v46, %v412_v47 }
 0x1ca   : > { %v424_v5 = vrot.slane %v417_v56, %v2175_v23  ;;  %v432_v6 = vrot.slane %v1551_v57, %v2175_v23 }
 0x1cb   : > { %v440_v7 = vrot.slane %v433_v58, %v2175_v23  ;;  %v448_v8 = vrot.slane %v1552_v59, %v2175_v23 }
 0x1cc   : > { %v449_v21 = vcombine.low %v424_v5, %v432_v6  ;;  %v450_v37 = vcombine.high %v424_v5, %v432_v6 }
 0x1cd   : > { %v465_v22 = vcombine.low %v440_v7, %v448_v8 }
 0x1ce   : > { %v457_v30 = vrot.slane %v449_v21, %v2183_v33  ;;  %v464_v45 = vrot.slane %v450_v37, %v2183_v33 }
 0x22e   : > { %v492_v32 = vpop.permute.xlu0 %491 }
 0x232   : > { %v494_v38 = vpop.permute.xlu1 %493  ;;  %v496_v39 = vpop.permute.xlu0 %495 }
 0x233   : > { %v501_v40 = vcombine.low %v490_v31, %v494_v38  ;;  %v502_v41 = vcombine.high %v490_v31, %v494_v38  ;;  %v517_v42 = vcombine.low %v492_v32, %v496_v39  ;;  %v518_v43 = vcombine.high %v492_v32, %v496_v39 }
 0x234   : > { %v473_v31 = vrot.slane %v465_v22, %v2183_v33  ;;  %v466_v38 = vcombine.high %v440_v7, %v448_v8 }
 0x235   : > { %v509_v48 = vrot.slane %v501_v40, %v2175_v23  ;;  %v516_v49 = vrot.slane %v502_v41, %v2175_v23  ;;  %v525_v50 = vrot.slane %v517_v42, %v2175_v23  ;;  %v532_v51 = vrot.slane %v518_v43, %v2175_v23 }
 0x236   : > { %v481_v39 = vcombine.low %v457_v30, %v473_v31  ;;  %v482_v40 = vcombine.high %v457_v30, %v473_v31  ;;  %v480_v46 = vrot.slane %v466_v38, %v2183_v33 }
 0x237   : > { %v533_v52 = vcombine.low %v509_v48, %v525_v50  ;;  %v534_v53 = vcombine.high %v509_v48, %v525_v50  ;;  %v549_v54 = vcombine.low %v516_v49, %v532_v51  ;;  %v550_v55 = vcombine.high %v516_v49, %v532_v51 }
 0x238   : > { %v485_v43 = vpack.c.bf16 %v481_v39, %v481_v39  ;;  %v486_v44 = vpack.c.bf16 %v482_v40, %v482_v40  ;;  %v483_v49 = vcombine.low %v464_v45, %v480_v46  ;;  %v484_v50 = vcombine.high %v464_v45, %v480_v46 }
 0x239   : > { %v541_v60 = vrot.slane %v533_v52, %v2183_v33  ;;  %v548_v61 = vrot.slane %v534_v53, %v2183_v33  ;;  %v557_v62 = vrot.slane %v549_v54, %v2183_v33  ;;  %v564_v63 = vrot.slane %v550_v55, %v2183_v33 }
 0x23a   : > { %v487_v51 = vpack.c.bf16 %v483_v49, %v483_v49  ;;  %v488_v52 = vpack.c.bf16 %v484_v50, %v484_v50 }
 0x23b   : > { %v569_v1 = vcombine.low %v541_v60, %v548_v61  ;;  %v1553_v2 = vcombine.high %v541_v60, %v548_v61  ;;  %v585_v3 = vcombine.low %v557_v62, %v564_v63  ;;  %v1554_v4 = vcombine.high %v557_v62, %v564_v63 }
 0x23d   : > { %v576_v9 = vrot.slane %v569_v1, %v2175_v23  ;;  %v584_v10 = vrot.slane %v1553_v2, %v2175_v23  ;;  %v592_v11 = vrot.slane %v585_v3, %v2175_v23  ;;  %v600_v14 = vrot.slane %v1554_v4, %v2175_v23 }
 0x23f   : > { %v601_v15 = vcombine.low %v576_v9, %v584_v10  ;;  %v617_v16 = vcombine.low %v592_v11, %v600_v14  ;;  %v602_v17 = vcombine.high %v576_v9, %v584_v10  ;;  %v618_v18 = vcombine.high %v592_v11, %v600_v14  ;;  %v644_v10 = vpop.permute.xlu1 %643  ;;  %v642_v11 = vpop.permute.xlu0 %641 }
 0x241   : > { %v609_v19 = vrot.slane %v601_v15, %v2183_v33  ;;  %v625_v20 = vrot.slane %v617_v16, %v2183_v33  ;;  %v616_v26 = vrot.slane %v602_v17, %v2183_v33  ;;  %v632_v27 = vrot.slane %v618_v18, %v2183_v33 }
 0x243   : > { %v633_v24 = vcombine.low %v609_v19, %v625_v20  ;;  %v634_v25 = vcombine.high %v609_v19, %v625_v20  ;;  %v635_v35 = vcombine.low %v616_v26, %v632_v27  ;;  %v636_v36 = vcombine.high %v616_v26, %v632_v27 }
 0x245   : > { %v637_v28 = vpack.c.bf16 %v633_v24, %v633_v24  ;;  %v638_v29 = vpack.c.bf16 %v634_v25, %v634_v25  ;;  %v639_v41 = vpack.c.bf16 %v635_v35, %v635_v35  ;;  %v640_v42 = vpack.c.bf16 %v636_v36, %v636_v36 }
 0x247   : > { %v798_v32 = vsel %vm793_vm2, %v637_v28, 0  ;;  %v844_v34 = vsel %vm793_vm2, %v638_v29, 0  ;;  %v890_v47 = vsel %vm793_vm2, %v639_v41, 0  ;;  %v936_v48 = vsel %vm793_vm2, %v640_v42, 0 }
 0x248   : > { %1606 = vmatpush3.bf16.xpose.msra.mxu1 %v798_v32  ;;  %1612 = vmatpush3.bf16.xpose.msra.mxu0 %v844_v34 }
 0x249   : > { %1617 = vmatprep.subr.bf16.mxu1 %v1925_v0  ;;  %1623 = vmatprep.subr.bf16.mxu0 %v1925_v0 }
 0x24f   : > { %1608 = vmatmul.mubr.msk.bf16.vlgmr.msra.gmra.mrb[0].mxu1 %vm793_vm2, %v485_v43  ;;  %1614 = vmatmul.mubr.msk.bf16.vlgmr.msra.gmra.mrb[4].mxu0 %vm793_vm2, %v486_v44 }
 0x250   : > { %1618 = vmatpush3.bf16.xpose.msra.mxu1 %v890_v47  ;;  %1624 = vmatpush3.bf16.xpose.msra.mxu0 %v936_v48 }
 0x251   : > { %1619 = vmatprep.mubr.msk.bf16.mxu1 %vm1926_vm0, %v1925_v0  ;;  %1625 = vmatprep.mubr.msk.bf16.mxu0 %vm1926_vm0, %v1925_v0 }
 0x252   : > { %1629 = vmatprep.subr.bf16.mxu1 %v1925_v0  ;;  %1635 = vmatprep.subr.bf16.mxu0 %v1925_v0 }
 0x257   : > { %1620 = vmatmul.mubr.msk.bf16.vlgmr.msra.gmra.mrb[4].mxu1 %vm793_vm2, %v487_v51  ;;  %1626 = vmatmul.mubr.msk.bf16.vlgmr.msra.gmra.mrb[8].mxu0 %vm793_vm2, %v488_v52 }
 0x258   : > { %1631 = vmatprep.mubr.msk.bf16.mxu1 %vm1926_vm0, %v1925_v0  ;;  %1637 = vmatprep.mubr.msk.bf16.mxu0 %vm1926_vm0, %v1925_v0 }
 0x322   : > { %v834_v53 = vpop.f32.mrb[0].mxu1  ;;  %v880_v54 = vpop.f32.mrb[4].mxu0 }
 0x323   : > { %v1609_v55 = vpop.f32.mrb[1].mxu1  ;;  %v1615_v56 = vpop.f32.mrb[5].mxu0  ;;  %v978_v57 = vsel %vm793_vm2, %v834_v53, -inf  ;;  %v981_v58 = vsel %vm793_vm2, %v880_v54, -inf }
 0x324   : > { %979 = vmax.xlane.f32.xlu1 %v978_v57  ;;  %v837_v59 = vpop.f32.mrb[2].mxu1  ;;  %982 = vmax.xlane.f32.xlu0 %v981_v58  ;;  %v883_v60 = vpop.f32.mrb[6].mxu0 }
 0x325   : > { %v1610_v61 = vpop.f32.mrb[3].mxu1  ;;  %v1616_v62 = vpop.f32.mrb[7].mxu0 }
 0x32a   : > { %v2235_v63 = vpop.f32.mrb[4].mxu1  ;;  %v2237_v1 = vpop.f32.mrb[8].mxu0 }
 0x32b   : > { %v1621_v2 = vpop.f32.mrb[5].mxu1  ;;  %v1627_v3 = vpop.f32.mrb[9].mxu0  ;;  %v984_v8 = vsel %vm793_vm2, %v2235_v63, -inf  ;;  %v987_v9 = vsel %vm793_vm2, %v2237_v1, -inf }
 0x32c   : > { %v929_v4 = vpop.f32.mrb[6].mxu1  ;;  %v975_v5 = vpop.f32.mrb[10].mxu0 }
 0x32d   : > { %v1622_v6 = vpop.f32.mrb[7].mxu1  ;;  %v1628_v7 = vpop.f32.mrb[11].mxu0 }
 0x335   : > { %645 = vrot.lane.b32.xlu1 %v2167_v13, %s1931_s7 }
 0x33a   : > { %647 = vrot.lane.b32.xlu0 %v2165_v12, %s1931_s7  ;;  %s1854_s7 = scalar_lea.vmem %s1853_s28, 256 }
 0x33b   : > { %p1856_p9 = scmp.lt.s32.totalorder %s1854_s7, %s1848_s13 }
 0x33d   : > { %p1857_p12 = por %p1856_p9, %p1855_p7 }
 0x33f   : > { %p1858_p2 = pnand %p1857_p12, %p1851_p3 }
 0x359   : > { %985 = vmax.xlane.f32.xlu1 %v984_v8  ;;  %988 = vmax.xlane.f32.xlu0 %v987_v9 }
 0x3b1   : > { %v980_v14 = vpop.xlane.xlu1 %979  ;;  %v983_v15 = vpop.xlane.xlu0 %982 }
 0x3b2   : > { %v990_v16 = vsub.f32 %v834_v53, %v980_v14  ;;  %v991_v17 = vsub.f32 %v880_v54, %v983_v15 }
 0x3b4   : > { %v994_v18 = vmul.f32 1.442695, %v990_v16  ;;  %v996_v19 = vmul.f32 1.442695, %v991_v17 }
 0x3b5   : > { %v646_v13 = vpop.permute.xlu1 %645  ;;  %v648_v20 = vpop.permute.xlu0 %647 }
 0x3b6   : > { %1746 = vpow2.f32 %v994_v18  ;;  %v653_v12 = vcombine.low %v642_v11, %v646_v13  ;;  %v654_v21 = vcombine.high %v642_v11, %v646_v13  ;;  %v669_v22 = vcombine.low %v644_v10, %v648_v20 }
 0x3b7   : > { %1748 = vpow2.f32 %v996_v19  ;;  %v670_v24 = vcombine.high %v644_v10, %v648_v20 }
 0x3b8   : > { %v661_v25 = vrot.slane %v653_v12, %v2175_v23  ;;  %v668_v26 = vrot.slane %v654_v21, %v2175_v23  ;;  %v677_v27 = vrot.slane %v669_v22, %v2175_v23 }
 0x3b9   : > { %v684_v28 = vrot.slane %v670_v24, %v2175_v23 }
 0x3ba   : > { %v685_v29 = vcombine.low %v661_v25, %v677_v27  ;;  %v686_v30 = vcombine.high %v661_v25, %v677_v27 }
 0x3bb   : > { %v701_v31 = vcombine.low %v668_v26, %v684_v28  ;;  %v702_v32 = vcombine.high %v668_v26, %v684_v28 }
 0x3bc   : > { %v693_v34 = vrot.slane %v685_v29, %v2183_v33  ;;  %v700_v35 = vrot.slane %v686_v30, %v2183_v33 }
 0x3bd   : > { %v709_v36 = vrot.slane %v701_v31, %v2183_v33  ;;  %v716_v37 = vrot.slane %v702_v32, %v2183_v33 }
 0x3be   : > { %v721_v38 = vcombine.low %v693_v34, %v700_v35  ;;  %v1555_v39 = vcombine.high %v693_v34, %v700_v35 }
 0x3bf   : > { %v737_v40 = vcombine.low %v709_v36, %v716_v37  ;;  %v1556_v41 = vcombine.high %v709_v36, %v716_v37 }
 0x3c0   : > { %v1747_v42 = vpop.eup %1746  ;;  %v728_v43 = vrot.slane %v721_v38, %v2175_v23  ;;  %v736_v44 = vrot.slane %v1555_v39, %v2175_v23 }
 0x3c1   : > { %v1749_v45 = vpop.eup %1748  ;;  %v744_v46 = vrot.slane %v737_v40, %v2175_v23  ;;  %v752_v47 = vrot.slane %v1556_v41, %v2175_v23  ;;  %v1002_v48 = vsel %vm793_vm2, %v1747_v42, 0.0  ;;  %v1014_v7 = vpack.c.bf16 %v1747_v42, %v1747_v42 }
 0x3c2   : > { %v1005_v49 = vsel %vm793_vm2, %v1749_v45, 0.0  ;;  %1003 = vadd.xlane.f32.xlu0 %v1002_v48  ;;  %v753_v50 = vcombine.low %v728_v43, %v736_v44  ;;  %v754_v51 = vcombine.high %v728_v43, %v736_v44  ;;  %v1015_v8 = vpack.c.bf16 %v1749_v45, %v1749_v45 }
 0x3c3   : > { %1006 = vadd.xlane.f32.xlu1 %v1005_v49  ;;  %v769_v52 = vcombine.low %v744_v46, %v752_v47  ;;  %v770_v53 = vcombine.high %v744_v46, %v752_v47 }
 0x3c4   : > { %v761_v54 = vrot.slane %v753_v50, %v2183_v33  ;;  %v768_v55 = vrot.slane %v754_v51, %v2183_v33 }
 0x3c5   : > { %v777_v56 = vrot.slane %v769_v52, %v2183_v33  ;;  %v784_v57 = vrot.slane %v770_v53, %v2183_v33 }
 0x3c7   : > { %v785_v58 = vcombine.low %v761_v54, %v777_v56  ;;  %v786_v59 = vcombine.high %v761_v54, %v777_v56  ;;  %v787_v60 = vcombine.low %v768_v55, %v784_v57  ;;  %v788_v61 = vcombine.high %v768_v55, %v784_v57 }
 0x3c9   : > { %v789_v62 = vpack.c.bf16 %v785_v58, %v785_v58  ;;  %v790_v2 = vpack.c.bf16 %v786_v59, %v786_v59  ;;  %v791_v5 = vpack.c.bf16 %v787_v60, %v787_v60  ;;  %v792_v6 = vpack.c.bf16 %v788_v61, %v788_v61  ;;  %v1744_v59 = vld [vmem:[#allocation7] sm:$0xff]  }
 0x3cb   : > { %v1023_v3 = vsel %vm1021_vm3, %v789_v62, 0  ;;  %v1069_v4 = vsel %vm1021_vm3, %v790_v2, 0  ;;  %v1115_v9 = vsel %vm1021_vm3, %v791_v5, 0  ;;  %v1161_v10 = vsel %vm1021_vm3, %v792_v6, 0 }
 0x3cc   : > { %1630 = vmatpush3.bf16.msra.mxu1 %v1023_v3  ;;  %1636 = vmatpush3.bf16.msra.mxu0 %v1069_v4 }
 0x3cd   : > { %1641 = vmatprep.subr.bf16.mxu1 %v1925_v0  ;;  %1647 = vmatprep.subr.bf16.mxu0 %v1925_v0 }
 0x3cf   : > { %1632 = vmatmul.mubr.msk.bf16.vlgmr.msra.gmra.mrb[8].mxu1 %vm793_vm2, %v1014_v7  ;;  %1638 = vmatmul.mubr.msk.bf16.vlgmr.msra.gmra.mrb[12].mxu0 %vm793_vm2, %v1015_v8  ;;  %v1745_v7 = vld [vmem:[#allocation7 + $0x8] sm:$0xff]  }
 0x3d0   : > { %1642 = vmatpush3.bf16.msra.mxu1 %v1115_v9  ;;  %1648 = vmatpush3.bf16.msra.mxu0 %v1161_v10 }
 0x3d1   : > { %1643 = vmatprep.mubr.msk.bf16.mxu1 %vm1926_vm0, %v1925_v0  ;;  %1649 = vmatprep.mubr.msk.bf16.mxu0 %vm1926_vm0, %v1925_v0 }
 0x3d2   : > { %1653 = vmatprep.subr.bf16.mxu1 %v1925_v0 }
 0x3e6   : > { %v986_v11 = vpop.xlane.xlu1 %985  ;;  %v989_v14 = vpop.xlane.xlu0 %988 }
 0x3e7   : > { %v992_v15 = vsub.f32 %v2235_v63, %v986_v11  ;;  %v993_v16 = vsub.f32 %v2237_v1, %v989_v14 }
 0x3e9   : > { %v998_v17 = vmul.f32 1.442695, %v992_v15  ;;  %v1000_v18 = vmul.f32 1.442695, %v993_v16 }
 0x3eb   : > { %1750 = vpow2.f32 %v998_v17 }
 0x3ec   : > { %1752 = vpow2.f32 %v1000_v18 }
 0x3f5   : > { %v1751_v19 = vpop.eup %1750 }
 0x3f6   : > { %v1753_v13 = vpop.eup %1752  ;;  %v1008_v20 = vsel %vm793_vm2, %v1751_v19, 0.0  ;;  %v1016_v12 = vpack.c.bf16 %v1751_v19, %v1751_v19 }
 0x3f7   : > { %1009 = vadd.xlane.f32.xlu0 %v1008_v20  ;;  %v1011_v21 = vsel %vm793_vm2, %v1753_v13, 0.0  ;;  %v1017_v22 = vpack.c.bf16 %v1753_v13, %v1753_v13 }
 0x3f8   : > { %1012 = vadd.xlane.f32.xlu1 %v1011_v21  ;;  %1644 = vmatmul.mubr.msk.bf16.vlgmr.msra.gmra.mrb[12].mxu1 %vm793_vm2, %v1016_v12 }
 0x3f9   : > { %1650 = vmatmul.mubr.msk.bf16.vlgmr.msra.gmra.mrb[16].mxu0 %vm793_vm2, %v1017_v22  ;;  %1657 = vmatprep.mubr.msk.bf16.mxu1 %vm1926_vm0, %v1925_v0 }
 0x3fa   : > { %1654 = vmatpush3.bf16.msra.mxu1 %v1744_v59 }
 0x3fb   : > { %1655 = vmatprep.subr.bf16.mxu1 %v1925_v0 }
 0x3fe   : > { %1656 = vmatpush3.bf16.msra.mxu1 %v1745_v7 }
 0x44f   : > { %v1004_v30 = vpop.xlane.xlu0 %1003 }
 0x450   : > { %v1007_v31 = vpop.xlane.xlu1 %1006  ;;  %1754 = vrcp.f32 %v1004_v30 }
 0x451   : > { %1756 = vrcp.f32 %v1007_v31  ;;  %v1567_v31 = vld [vmem:[%s2363_s4] ss:$0 sm:$0xff] }
 0x45a   : > { %v1755_v35 = vpop.eup %1754 }
 0x45b   : > { %v1757_v36 = vpop.eup %1756 }
 0x484   : > { %v1010_v32 = vpop.xlane.xlu0 %1009 }
 0x485   : > { %v1013_v34 = vpop.xlane.xlu1 %1012  ;;  %1758 = vrcp.f32 %v1010_v32 }
 0x486   : > { %1760 = vrcp.f32 %v1013_v34 }
 0x48f   : > { %v1759_v37 = vpop.eup %1758 }
 0x490   : > { %v1761_v39 = vpop.eup %1760 }
 0x4a2   : > { %v1059_v63 = vpop.f32.mrb[8].mxu1  ;;  %v1105_v1 = vpop.f32.mrb[12].mxu0 }
 0x4a3   : > { %v1633_v24 = vpop.f32.mrb[9].mxu1  ;;  %v1639_v25 = vpop.f32.mrb[13].mxu0  ;;  %v1207_v40 = vmul.f32 %v1755_v35, %v1059_v63  ;;  %v1208_v44 = vmul.f32 %v1757_v36, %v1105_v1 }
 0x4a4   : > { %v1062_v26 = vpop.f32.mrb[10].mxu1  ;;  %v1108_v27 = vpop.f32.mrb[14].mxu0 }
 0x4a5   : > { %v1634_v28 = vpop.f32.mrb[11].mxu1  ;;  %v1640_v29 = vpop.f32.mrb[15].mxu0 }
 0x4cb   : > { %v1151_v38 = vpop.f32.mrb[12].mxu1 }
 0x4cc   : > { %v1209_v41 = vmul.f32 %v1759_v37, %v1151_v38  ;;  %v1197_v42 = vpop.f32.mrb[16].mxu0  ;;  %v1645_v43 = vpop.f32.mrb[13].mxu1 }
 0x4cd   : > { %v1210_v45 = vmul.f32 %v1761_v39, %v1197_v42  ;;  %v1651_v46 = vpop.f32.mrb[17].mxu0  ;;  %v1154_v47 = vpop.f32.mrb[14].mxu1 }
 0x4ce   : > { %v1211_v48 = vcombine.low %v1207_v40, %v1209_v41  ;;  %v1212_v49 = vcombine.high %v1207_v40, %v1209_v41  ;;  %v1200_v50 = vpop.f32.mrb[18].mxu0  ;;  %v1646_v51 = vpop.f32.mrb[15].mxu1 }
 0x4cf   : > { %v1227_v52 = vcombine.low %v1208_v44, %v1210_v45  ;;  %v1228_v53 = vcombine.high %v1208_v44, %v1210_v45  ;;  %v1652_v54 = vpop.f32.mrb[19].mxu0 }
 0x4d0   : > { %v1219_v55 = vrot.slane %v1211_v48, %v2175_v23  ;;  %v1226_v56 = vrot.slane %v1212_v49, %v2175_v23 }
 0x4d1   : > { %v1235_v57 = vrot.slane %v1227_v52, %v2175_v23  ;;  %v1242_v58 = vrot.slane %v1228_v53, %v2175_v23 }
 0x4d3   : > { %v1243_v60 = vcombine.low %v1219_v55, %v1235_v57  ;;  %v1244_v61 = vcombine.high %v1219_v55, %v1235_v57  ;;  %v1259_v62 = vcombine.low %v1226_v56, %v1242_v58  ;;  %v1260_v2 = vcombine.high %v1226_v56, %v1242_v58 }
 0x4d5   : > { %v1251_v3 = vrot.slane %v1243_v60, %v2183_v33  ;;  %v1258_v4 = vrot.slane %v1244_v61, %v2183_v33  ;;  %v1267_v5 = vrot.slane %v1259_v62, %v2183_v33  ;;  %v1274_v6 = vrot.slane %v1260_v2, %v2183_v33 }
 0x4d7   : > { %v1279_v8 = vcombine.low %v1251_v3, %v1258_v4  ;;  %v1565_v9 = vcombine.high %v1251_v3, %v1258_v4  ;;  %v1295_v10 = vcombine.low %v1267_v5, %v1274_v6  ;;  %v1566_v11 = vcombine.high %v1267_v5, %v1274_v6 }
 0x4d9   : > { %v1286_v14 = vrot.slane %v1279_v8, %v2175_v23  ;;  %v1294_v15 = vrot.slane %v1565_v9, %v2175_v23  ;;  %v1302_v16 = vrot.slane %v1295_v10, %v2175_v23  ;;  %v1310_v17 = vrot.slane %v1566_v11, %v2175_v23 }
 0x4db   : > { %v1312_v18 = vcombine.high %v1286_v14, %v1294_v15  ;;  %v1328_v19 = vcombine.high %v1302_v16, %v1310_v17  ;;  %v1311_v13 = vcombine.low %v1286_v14, %v1294_v15  ;;  %v1327_v20 = vcombine.low %v1302_v16, %v1310_v17 }
 0x4dd   : > { %v1326_v0 = vrot.slane %v1312_v18, %v2183_v33  ;;  %v1342_v12 = vrot.slane %v1328_v19, %v2183_v33  ;;  %v1319_v21 = vrot.slane %v1311_v13, %v2183_v33  ;;  %v1335_v22 = vrot.slane %v1327_v20, %v2183_v33 }
 0x4df   : > { %v1345_v63 = vcombine.low %v1326_v0, %v1342_v12  ;;  %v1344_v1 = vcombine.high %v1319_v21, %v1335_v22  ;;  %v1346_v24 = vcombine.high %v1326_v0, %v1342_v12  ;;  %v1343_v25 = vcombine.low %v1319_v21, %v1335_v22 }
 0x4e1   : > { %1352 = vrot.lane.b32.xlu1 %v1345_v63, %s1934_s6  ;;  %1348 = vrot.lane.b32.xlu0 %v1344_v1, %s1935_s30 }
 0x4e5   : > { %1356 = vrot.lane.b32.xlu1 %v1346_v24, %s1936_s15 }
 0x553   : > { %v1353_v23 = vpop.permute.xlu1 %1352  ;;  %v1349_v26 = vpop.permute.xlu0 %1348 }
 0x554   : > { %v1359_v27 = vsel %vm793_vm2, %v1343_v25, %v1349_v26 }
 0x555   : > { %v1361_v33 = vsel %vm1360_vm4, %v1359_v27, %v1353_v23 }
 0x557   : > { %v1357_v28 = vpop.permute.xlu1 %1356 }
 0x558   : > { %v1363_v29 = vsel %vm1362_vm5, %v1361_v33, %v1357_v28 }
 0x559   : > { %v1364_v30 = vpack.c.bf16 %v1363_v29, %v1363_v29 }
 0x55b   : > { %1658 = vmatmul.mubr.msk.bf16.vlgmr.msra.gmra.mrb[16].mxu1 %vm295_vm1, %v1364_v30 }
 0x62e   : > { %v1425_v32 = vpop.f32.mrb[16].mxu1 }
 0x62f   : > { %v1426_v34 = vadd.f32 %v1567_v31, %v1425_v32  ;;  %v1659_v35 = vpop.f32.mrb[17].mxu1 }
 0x630   : > { %v1428_v36 = vpop.f32.mrb[18].mxu1 }
 0x631   : > { %v1660_v37 = vpop.f32.mrb[19].mxu1  ;;  %1431 = vst.msk [vmem:[%s268_s17] sm:$0xff] %vm295_vm1, %v1426_v34 }
 0x632   : > { %1861 = shalt.err (!%p1858_p2)
}
 0x633   : > { %s1862_s12 = scalar_lea.hbm %s2314_s10, 128  ;;  %s1866_s15 = scalar_lea.hbm %s2364_s5, 256 }
 0x634   : > { %p1863_p13 = scmp.ne.s32.totalorder %s2314_s10, %s1862_s12  ;;  %p1867_p4 = scmp.lt.u32.totalorder %s2314_s10, %s2364_s5 }
 0x635   : > { %p1868_p5 = scmp.lt.u32.totalorder %s1866_s15, %s1862_s12  ;;  %p1870_p11 = scmp.lt.u32.totalorder %s1862_s12, %s2314_s10 }
 0x636   : > { %p1864_p6 = pnand %p1863_p13, %p2378_p0 }
 0x637   : > { %p1869_p8 = por %p1868_p5, %p1867_p4 }
 0x638   : > { %p1865_p10 = pneg %p1864_p6 }
 0x639   : > { %p1871_p1 = por %p1870_p11, %p1869_p8 }
 0x63b   : > { %p1872_p3 = pnand %p1871_p1, %p1865_p10 }
 0x63d   : > { %1875 = shalt.err (!%p1872_p3)
}
 0x63e   : > { %1671 = dma.vmem_to_hbm [thread:$0]  (%p2378_p0), %s2316_s24, 128, %s2314_s10, %s1433_s22  }
 0x63f PF: > { %s1458_s29 = sand.u32 1, %s1906_s18   ;;  %p2379_p7 = scmp.ne.s32.totalorder %s2369_s25, 0 }
 0x640   : > { %p2380_p9 = scmp.ge.s32.totalorder %s1918_s21, 2  ;;  %s1459_s17 = scalar_lea.sflag [#allocation4], %s1458_s29 }
 0x642   : > { %p1685_p12 = pnand %p2380_p9, %p2379_p7 }
 0x644   : > { %1901 = dma.done.wait (!%p1685_p12), %s1459_s17, 128  }
 0x645   : > { %1903 = vsyncadd (!%p1685_p12), %s1459_s17, 4294967168  ;;  %p19_p2 = scmp.ge.s32.totalorder %s2078_s14, 4   ;;  %s2381_s18 = smov %s1910_s19 }
 0x646   : > { %s2382_s19 = smov %s1914_s20  ;;  %s2383_s20 = smov %s2094_s27 }
 0x647   : > { %s2384_s21 = smov %s2078_s14  ;;  %21 = sbr.rel (!%p19_p2) target bundleno = 6 (0x6), region = 93 }
 0x64e   :  { %1464 = vsyncpa [#allocation3], 1 }
 0x64f   :  { %1466 = vsyncpa [#allocation3 + $0x1], 1 }
 0x650   :  { %1467 = vsyncpa [#allocation6], 1 }
 0x651   :  { %1468 = vsyncpa [#allocation4], 1 }
 0x652   :  { %1470 = vsyncpa [#allocation4 + $0x1], 1 }

</bundles_post_ra>
